<compile_context>
chip_gen: v7x
topology: tpu7x:2x2x1
jax: 0.10.0
libtpu: 0.0.40
codegen_flags: <defaults>
</compile_context>

<pallas_src>
import functools

import jax
import jax.numpy as jnp
from jax import lax
from jax.experimental import pallas as pl
from jax.experimental.pallas import tpu as pltpu


def _jastrow_kernel(w_ref, sw_ref, pos_ref, out_ref, *, nelec_pad, ndim):
    """Per-batch-tile Jastrow factor (batch on lanes).

    w_ref   : SMEM (1,) f32                     -- variational weight w
    sw_ref  : VMEM (8, nelec_pad^2) f32         -- row 0 = flattened static spin
                                                   weights, pre-masked to i<j,
                                                   rows 1..7 zero (MXU LHS)
    pos_ref : VMEM (ndim, nelec_pad, BT) f32    -- electron coordinates
    out_ref : VMEM (1, BT) f32                  -- prod_{i<j} exp(B_ij)
    """
    w = w_ref[0]
    bt = pos_ref.shape[-1]
    n2 = nelec_pad * nelec_pad

    # Pairwise squared distances, accumulated per spatial dim (ndim==3,
    # unrolled).  All intermediates are (nelec_pad, nelec_pad, BT): lanes=batch.
    x0 = pos_ref[0]
    diff = x0[:, None, :] - x0[None, :, :]
    r2 = diff * diff
    for d in range(1, ndim):
        x = pos_ref[d]
        diff = x[:, None, :] - x[None, :, :]
        r2 = r2 + diff * diff

    # Pade kernel, algebraic rewrite:  r/(1 + w r) == 1/(w + 1/r).
    # rsqrt + reciprocal both go to the EUP slot; the tiny epsilon keeps 1/r
    # finite on the diagonal / padded pairs (their static weight is zero).
    inv_r = lax.rsqrt(r2 + 1e-30)
    g = pl.reciprocal(w + inv_r, approx=False)        # (nelec_pad, nelec_pad, BT)

    # sum_{i<j} sw_ij * g_ij as an MXU matvec: (8, n2) @ (n2, BT) -> (8, BT),
    # only row 0 carries the real weights.  One exp per batch lane.
    g2 = g.reshape(n2, bt)
    s = jnp.dot(sw_ref[...], g2, preferred_element_type=jnp.float32)
    out_ref[...] = jnp.exp(s[0:1, :])


def _vmem_estimate(bt, nelec_pad, ndim):
    """Conservative f32 VMEM footprint (bytes) for one grid step, +20% headroom."""
    n2 = nelec_pad * nelec_pad
    words = (2 * ndim * nelec_pad * bt    # double-buffered position blocks
             + 2 * bt                     # double-buffered output blocks
             + 8 * n2                     # resident static-weight matvec LHS
             + 6 * n2 * bt)               # diff/r2/inv_r/g/g2/dot temporaries
    return int(1.2 * 4 * words)


def two_body_jastrow(pos, weight, static_weight, *, batch_tile=None):
    """pos: (Nbatch, Nelec*3) f32 -> (Nbatch, 1) f32."""
    nelec = static_weight.shape[0]
    ndim = 3
    nbatch = pos.shape[0]
    assert pos.shape[1] == nelec * ndim

    # Pad electron count up to a multiple of 8 for full sublane occupancy.
    nelec_pad = max(8, ((nelec + 7) // 8) * 8)
    n2 = nelec_pad * nelec_pad

    # Generation-aware VMEM cap (v7x has 64 MiB physical vs 128 on v5e/v6e).
    try:
        phys_vmem = pltpu.get_tpu_info().vmem_capacity_bytes
    except Exception:
        phys_vmem = 64 << 20          # conservative fallback (v7x-sized)
    vmem_cap = int(0.75 * phys_vmem)

    # Batch-tile selection: largest power-of-two multiple of 128 (<= 8192) that
    # divides nbatch, keeps >= 2 grid steps (v7x has 2 TCs fed by the parallel
    # axis) and fits the VMEM cap.
    if batch_tile is None:
        if nbatch % 128 != 0:
            bt = nbatch
        else:
            bt = 128
            while (bt * 2 <= 8192
                   and nbatch % (bt * 2) == 0
                   and nbatch // (bt * 2) >= 2
                   and _vmem_estimate(bt * 2, nelec_pad, ndim) <= vmem_cap):
                bt *= 2
    else:
        bt = min(batch_tile, nbatch)
    assert nbatch % bt == 0, "nbatch must be a multiple of the batch tile"
    assert bt == nbatch or bt % 128 == 0

    # (Nbatch, Nelec*Ndim) -> (Ndim, Nelec_pad, Nbatch): batch on lanes,
    # zero-padded electrons.
    pos3 = pos.reshape(nbatch, nelec, ndim).transpose(2, 1, 0).astype(jnp.float32)
    if nelec_pad != nelec:
        pos3 = jnp.pad(pos3, ((0, 0), (0, nelec_pad - nelec), (0, 0)))
    weight = weight.astype(jnp.float32)

    # Pre-mask the static weights to the strict upper triangle (i<j), zero-pad,
    # and place them in row 0 of an (8, n2) MXU LHS (rows 1..7 are zero).
    tri = jnp.triu(jnp.ones((nelec, nelec), jnp.float32), k=1)
    sw = static_weight.astype(jnp.float32) * tri
    sw_pad = jnp.zeros((nelec_pad, nelec_pad), jnp.float32).at[:nelec, :nelec].set(sw)
    sw_lhs = jnp.zeros((8, n2), jnp.float32).at[0].set(sw_pad.reshape(-1))

    kernel = functools.partial(_jastrow_kernel, nelec_pad=nelec_pad, ndim=ndim)
    grid = (nbatch // bt,)

    est = _vmem_estimate(bt, nelec_pad, ndim)
    cp_kwargs = dict(
        dimension_semantics=("parallel",),
        # Let XLA fuse the wrapper-side transpose into the position operand
        # instead of materializing it through HBM.
        allow_input_fusion=[False, False, True],
    )
    if est > (30 << 20):
        cp_kwargs["vmem_limit_bytes"] = min(max(est, 32 << 20), vmem_cap)

    out = pl.pallas_call(
        kernel,
        out_shape=jax.ShapeDtypeStruct((1, nbatch), jnp.float32),
        grid=grid,
        in_specs=[
            pl.BlockSpec(memory_space=pltpu.MemorySpace.SMEM),        # weight (1,)
            pl.BlockSpec((8, n2), lambda b: (0, 0)),                  # masked sw LHS
            pl.BlockSpec((ndim, nelec_pad, bt), lambda b: (0, 0, b)), # positions
        ],
        out_specs=pl.BlockSpec((1, bt), lambda b: (0, b)),            # lane-dense
        compiler_params=pltpu.CompilerParams(**cp_kwargs),
    )(weight, sw_lhs, pos3)

    return out.reshape(nbatch, 1)


def _make_static_weight(nup, ndown):
    bup = jnp.concatenate(
        [0.25 * jnp.ones((nup, nup)), 0.5 * jnp.ones((nup, ndown))], axis=1)
    bdown = jnp.concatenate(
        [0.5 * jnp.ones((ndown, nup)), 0.25 * jnp.ones((ndown, ndown))], axis=1)
    return jnp.concatenate([bup, bdown], axis=0).astype(jnp.float32)


def _reference(pos, weight, static_weight):
    """Plain-JAX replica of the PyTorch forward (derivative=0)."""
    nelec = static_weight.shape[0]
    nbatch = pos.shape[0]
    xyz = pos.reshape(nbatch, nelec, 3)
    diff = xyz[:, :, None, :] - xyz[:, None, :, :]
    r = jnp.sqrt(jnp.sum(diff * diff, axis=-1))
    bker = static_weight[None] * r / (1.0 + weight[0] * r)
    jast = jnp.exp(bker)
    mask = jnp.triu(jnp.ones((nelec, nelec), bool), k=1)
    jast = jnp.where(mask[None], jast, 1.0)
    return jnp.prod(jast, axis=(1, 2))[:, None]


if __name__ == "__main__":
    nup, ndown = 2, 2
    nelec, ndim = nup + ndown, 3
    nbatch = 256          # auto-tiling -> 2 x 128-lane tiles (keeps v7x 2-TC busy)

    # deterministic parameter init (mirrors nn.Parameter(torch.tensor([w])))
    weight = jnp.array([1.0], dtype=jnp.float32)
    static_weight = _make_static_weight(nup, ndown)

    key = jax.random.PRNGKey(0)
    pos = jax.random.normal(key, (nbatch, nelec * ndim), dtype=jnp.float32)

    out = jax.block_until_ready(two_body_jastrow(pos, weight, static_weight))
    ref = _reference(pos, weight, static_weight)

    assert out.shape == (nbatch, 1)
    err = float(jnp.max(jnp.abs(out - ref) / (jnp.abs(ref) + 1e-6)))
    assert err < 1e-3, f"max relative error {err:.3e}"
    print("KERNEL_OK")
</pallas_src>

<mosaic_0001>
module attributes {stable_mosaic.version = 11 : i64} {
  func.func @_jastrow_kernel(%arg0: i32, %arg1: memref<1xf32, #tpu.memory_space<smem>>, %arg2: memref<8x64xf32, #tpu.memory_space<vmem>>, %arg3: memref<3x8x128xf32, #tpu.memory_space<vmem>>, %arg4: memref<1x128xf32, #tpu.memory_space<vmem>>) attributes {dimension_semantics = [#tpu.dimension_semantics<parallel>], iteration_bounds = array<i64: 2>, scalar_prefetch = 0 : i64, scratch_operands = 0 : i64, tpu.core_type = #tpu.core_type<tc>, window_params = [{transform_indices = @transform_0, window_bounds = array<i64: 1>}, {pipeline_mode = #tpu.pipeline_mode<synchronous>, transform_indices = @transform_1, window_bounds = array<i64: 8, 64>}, {transform_indices = @transform_2, window_bounds = array<i64: 3, 8, 128>}, {transform_indices = @transform_3, window_bounds = array<i64: 1, 128>}]} {
    %c0 = arith.constant 0 : index
    %0 = memref.load %arg1[%c0] : memref<1xf32, #tpu.memory_space<smem>>
    %c0_0 = arith.constant 0 : index
    %c0_1 = arith.constant 0 : index
    %c0_2 = arith.constant 0 : index
    %1 = vector.load %arg3[%c0_0, %c0_1, %c0_2] : memref<3x8x128xf32, #tpu.memory_space<vmem>>, vector<1x8x128xf32>
    %2 = vector.shape_cast %1 : vector<1x8x128xf32> to vector<8x128xf32>
    %3 = vector.shape_cast %2 : vector<8x128xf32> to vector<8x1x128xf32>
    %4 = vector.shape_cast %2 : vector<8x128xf32> to vector<1x8x128xf32>
    %5 = vector.broadcast %3 : vector<8x1x128xf32> to vector<8x8x128xf32>
    %6 = vector.broadcast %4 : vector<1x8x128xf32> to vector<8x8x128xf32>
    %7 = arith.subf %5, %6 : vector<8x8x128xf32>
    %8 = arith.mulf %7, %7 : vector<8x8x128xf32>
    %c1 = arith.constant 1 : index
    %c0_3 = arith.constant 0 : index
    %c0_4 = arith.constant 0 : index
    %9 = vector.load %arg3[%c1, %c0_3, %c0_4] : memref<3x8x128xf32, #tpu.memory_space<vmem>>, vector<1x8x128xf32>
    %10 = vector.shape_cast %9 : vector<1x8x128xf32> to vector<8x128xf32>
    %11 = vector.shape_cast %10 : vector<8x128xf32> to vector<8x1x128xf32>
    %12 = vector.shape_cast %10 : vector<8x128xf32> to vector<1x8x128xf32>
    %13 = vector.broadcast %11 : vector<8x1x128xf32> to vector<8x8x128xf32>
    %14 = vector.broadcast %12 : vector<1x8x128xf32> to vector<8x8x128xf32>
    %15 = arith.subf %13, %14 : vector<8x8x128xf32>
    %16 = arith.mulf %15, %15 : vector<8x8x128xf32>
    %17 = arith.addf %8, %16 : vector<8x8x128xf32>
    %c2 = arith.constant 2 : index
    %c0_5 = arith.constant 0 : index
    %c0_6 = arith.constant 0 : index
    %18 = vector.load %arg3[%c2, %c0_5, %c0_6] : memref<3x8x128xf32, #tpu.memory_space<vmem>>, vector<1x8x128xf32>
    %19 = vector.shape_cast %18 : vector<1x8x128xf32> to vector<8x128xf32>
    %20 = vector.shape_cast %19 : vector<8x128xf32> to vector<8x1x128xf32>
    %21 = vector.shape_cast %19 : vector<8x128xf32> to vector<1x8x128xf32>
    %22 = vector.broadcast %20 : vector<8x1x128xf32> to vector<8x8x128xf32>
    %23 = vector.broadcast %21 : vector<1x8x128xf32> to vector<8x8x128xf32>
    %24 = arith.subf %22, %23 : vector<8x8x128xf32>
    %25 = arith.mulf %24, %24 : vector<8x8x128xf32>
    %26 = arith.addf %17, %25 : vector<8x8x128xf32>
    %cst = arith.constant 1.000000e-30 : f32
    %27 = vector.broadcast %cst : f32 to vector<8x8x128xf32>
    %28 = arith.addf %26, %27 : vector<8x8x128xf32>
    %29 = math.rsqrt %28 : vector<8x8x128xf32>
    %30 = vector.broadcast %0 : f32 to vector<8x8x128xf32>
    %31 = arith.addf %30, %29 : vector<8x8x128xf32>
    %32 = tpu.reciprocal %31 : vector<8x8x128xf32> -> vector<8x8x128xf32>
    %33 = vector.shape_cast %32 : vector<8x8x128xf32> to vector<64x128xf32>
    %c0_7 = arith.constant 0 : index
    %c0_8 = arith.constant 0 : index
    %34 = vector.load %arg2[%c0_7, %c0_8] : memref<8x64xf32, #tpu.memory_space<vmem>>, vector<8x64xf32>
    %cst_9 = arith.constant dense<0.000000e+00> : vector<8x128xf32>
    %35 = tpu.matmul %34, %33, %cst_9 {dimension_numbers = #tpu.dot_dimension_numbers<[1], [0], [0], [1], [0, 0, 1, 1], [], []>} : vector<8x64xf32>, vector<64x128xf32>, vector<8x128xf32> -> vector<8x128xf32>
    %36 = vector.extract_strided_slice %35 {offsets = [0, 0], sizes = [1, 128], strides = [1, 1]} : vector<8x128xf32> to vector<1x128xf32>
    %37 = math.exp %36 : vector<1x128xf32>
    %c0_10 = arith.constant 0 : index
    %c0_11 = arith.constant 0 : index
    %38 = vector.load %arg4[%c0_10, %c0_11] : memref<1x128xf32, #tpu.memory_space<vmem>>, vector<1x128xf32>
    tpu.vector_store %arg4[%c0_10, %c0_11], %37 {strides = array<i32>} : memref<1x128xf32, #tpu.memory_space<vmem>>, vector<1x128xf32>,
    return
  }
  func.func @transform_0(%arg0: i32) -> i32 {
    %c0_i32 = arith.constant 0 : i32
    %c0_i32_0 = arith.constant 0 : i32
    return %c0_i32 : i32
  }
  func.func @transform_1(%arg0: i32) -> (i32, i32) {
    %c0_i32 = arith.constant 0 : i32
    %c0_i32_0 = arith.constant 0 : i32
    %c0_i32_1 = arith.constant 0 : i32
    return %c0_i32, %c0_i32_0 : i32, i32
  }
  func.func @transform_2(%arg0: i32) -> (i32, i32, i32) {
    %c0_i32 = arith.constant 0 : i32
    %c0_i32_0 = arith.constant 0 : i32
    %c0_i32_1 = arith.constant 0 : i32
    return %c0_i32, %c0_i32_0, %arg0 : i32, i32, i32
  }
  func.func @transform_3(%arg0: i32) -> (i32, i32) {
    %c0_i32 = arith.constant 0 : i32
    %c0_i32_0 = arith.constant 0 : i32
    return %c0_i32, %arg0 : i32, i32
  }
}

</mosaic_0001>

<bundles_post_ra>
// kernel: tpu_custom_call.1
= control target key start
LH: loop header
LB: loop body
LE: loop exit
PB: predicated region body
PF: predicated region fallthrough
CT: control target
= control target key end

     0   :  { %s1366_s0 = inlined_call_operand.<no memory space> [shape: f32[1], index: 0, kind: input, shape index: {}]   ;;  %s1367_s1 = inlined_call_operand.hbm [shape: f32[8,64], index: 1, kind: input, shape index: {}]   ;;  %s1368_s2 = inlined_call_operand.hbm [shape: f32[3,8,256], index: 2, kind: input, shape index: {}]   ;;  %s1369_s3 = inlined_call_operand.hbm [shape: f32[1,256], index: 3, kind: output, shape index: {}]  }
   0x1   :  { %8 = sst [smem:[#allocation2]] %s1366_s0 }
   0x2   :  { %9 = vsyncpa [#allocation4], 0 }
   0x3   :  { %10 = vsyncpa [#allocation7], 0 }
   0x4   :  { %12 = vsyncpa [#allocation7 + $0x1], 0 }
   0x5   :  { %13 = vsyncpa [#allocation5], 0 }
   0x6   :  { %15 = vsyncpa [#allocation5 + $0x1], 0  ;;  %s1062_s14 = smov 0   ;;  %s1064_s15 = smov 0  }
   0x7   :  { %s1066_s16 = smov 0   ;;  %s1068_s17 = smov 0  }
   0x8 LB: > { %s1083_s0 = sadd.s32 4294967295, %s1027_s17   ;;  %s743_s18 = sadd.s32 4294967294, %s1027_s17   ;;  %s1027_s17 = sphi %s1068_s17, %s1394_s17   ;;  %s1023_s16 = sphi %s1066_s16, %s1393_s16   ;;  %s1019_s15 = sphi %s1064_s15, %s1392_s15   ;;  %s1015_s14 = sphi %s1062_s14, %s1391_s14  }
   0x9   : > { %s1087_s19 = sadd.s32 1, %s1027_s17   ;;  %s70_s20 = sadd.s32 1, %s1023_s16 }
   0xa   : > { %s67_s21 = ssub.s32 %s1027_s17, %s1087_s19  ;;  %p77_p0 = scmp.ne.s32.totalorder %s1023_s16, %s1019_s15 }
   0xb   : > { %p68_p1 = scmp.eq.s32.totalorder %s67_s21, 0  ;;  %p78_p2 = scmp.eq.s32.totalorder %s1027_s17, 0 }
   0xc   : > { %p83_p3 = scmp.ne.s32.totalorder %s1019_s15, %s1015_s14  ;;  %p1370_p4 = scmp.eq.s32.totalorder %s1083_s0, 0 }
   0xd   : > { %s1099_s22 = scalar_select %p68_p1, %s1023_s16, %s70_s20  }
   0xe   : > { %p1101_p5 = por %p78_p2, %p77_p0  ;;  %p1107_p6 = por %p1370_p4, %p83_p3 }
   0xf   : > { %p107_p7 = scmp.eq.s32.totalorder %s1083_s0, 1  ;;  %p113_p8 = scmp.eq.s32.totalorder %s743_s18, 1 }
  0x10   : > { %s1376_s24 = scalar_select %p1107_p6, 1, 0 }
  0x11   : > { %p744_p9 = scmp.ge.s32.totalorder %s1027_s17, 1  ;;  %p120_p10 = scmp.lt.s32.totalorder %s1027_s17, 3 }
  0x12   : > { %p1114_p11 = por %p107_p7, %p77_p0  ;;  %p1118_p12 = por %p113_p8, %p83_p3 }
  0x13   : > { %p1122_p13 = pnand %p744_p9, %p120_p10  ;;  %s1029_s28 = smov [#allocation3]  }
  0x14   : > { %s1377_s25 = scalar_select %p1114_p11, 1, 0 }
  0x15   : > { %s1378_s26 = scalar_select %p1118_p12, 1, 0 }
  0x16   : > { %s1379_s27 = scalar_select %p1122_p13, 1, 0 }
  0x17   : > { %p806_p2 = pneg %p1122_p13  ;;  %s136_s29 = sshll.u32 %s1029_s28, 4  ;;  %s137_s29 = int_to_ptr.vmem [resolvable:$true] %s136_s29 }
  0x18   : > { %p819_p4 = scmp.lt.s32.totalorder %s1027_s17, 2  ;;  %p1380_p0 = scmp.eq.s32.totalorder %s1083_s0, 0 }
  0x19   : > { %s147_s4 = sand.u32 1, %s1023_s16   ;;  %s899_s9 = scalar_lea.hbm %s1367_s1, 128 }
  0x1a   : > { %p1132_p7 = pnand %p806_p2, %p1380_p0  ;;  %p1139_p3 = pnand %p819_p4, %p1101_p5 }
  0x1b   : > { %s796_s6 = smul.u32 24, %s147_s4  ;;  %p900_p8 = scmp.ne.s32.totalorder %s1367_s1, %s899_s9 }
  0x1c   : > { %s1382_s5 = scalar_select %p1139_p3, 1, 0 }
  0x1d   : > { %p901_p9 = pneg %p1132_p7  ;;  %p906_p4 = scmp.lt.u32.totalorder %s899_s9, %s1367_s1 }
  0x1f   : > { %p902_p10 = pnand %p901_p9, %p900_p8 }
  0x21   : > { %p903_p2 = pneg %p902_p10 }
  0x23   : > { %p908_p5 = pnand %p906_p4, %p903_p2 }
  0x25   : > { %911 = shalt.err (!%p908_p5)
}
  0x26   : > { %s912_s18 = scalar_lea.vmem %s137_s29, 128  ;;  %p920_p11 = scmp.lt.s32.totalorder %s137_s29, %s137_s29 }
  0x27   : > { %p913_p0 = scmp.ne.s32.totalorder %s137_s29, %s912_s18  ;;  %p921_p6 = scmp.lt.s32.totalorder %s912_s18, %s912_s18 }
  0x29   : > { %p915_p1 = pnand %p913_p0, %p901_p9  ;;  %p922_p13 = por %p921_p6, %p920_p11 }
  0x2b   : > { %p916_p12 = pneg %p915_p1 }
  0x2d   : > { %p923_p3 = pnand %p922_p13, %p916_p12 }
  0x2f   : > { %926 = shalt.err (!%p923_p3)
}
  0x30   : > { %809 = dma.hbm_to_vmem [thread:$0]  (!%p1132_p7), %s1367_s1, 128, %s137_s29, [#allocation4]  }
  0x31   : > { %s747_s23 = sshll.u32 %s1027_s17, 7  ;;  %s151_s28 = scalar_lea.vmem [#allocation6], %s796_s6 }
  0x32   : > { %s157_s7 = sshll.u32 %s151_s28, 4  ;;  %s1163_s10 = scalar_lea.hbm %s1368_s2, %s747_s23  ;;  %s1165_s7 = int_to_ptr.vmem [resolvable:$true] %s157_s7 }
  0x33   : > { %s1167_s30 = scalar_lea.sflag [#allocation7], %s147_s4  ;;  %s927_s11 = scalar_lea.hbm %s1163_s10, 384 }
  0x34   : > { %p928_p6 = scmp.ne.s32.totalorder %s1163_s10, %s927_s11  ;;  %p1383_p11 = scmp.ne.s32.totalorder %s1382_s5, 0 }
  0x35   : > { %s932_s12 = scalar_lea.hbm %s1368_s2, 768  ;;  %p933_p7 = scmp.lt.u32.totalorder %s1163_s10, %s1368_s2 }
  0x36   : > { %p929_p12 = pneg %p1383_p11  ;;  %p934_p3 = scmp.lt.u32.totalorder %s932_s12, %s927_s11 }
  0x37   : > { %p936_p9 = scmp.lt.u32.totalorder %s927_s11, %s1163_s10 }
  0x38   : > { %p930_p13 = pnand %p929_p12, %p928_p6  ;;  %p935_p8 = por %p934_p3, %p933_p7 }
  0x3a   : > { %p931_p1 = pneg %p930_p13  ;;  %p937_p10 = por %p936_p9, %p935_p8 }
  0x3c   : > { %p938_p2 = pnand %p937_p10, %p931_p1 }
  0x3e   : > { %941 = shalt.err (!%p938_p2)
}
  0x3f   : > { %s942_s4 = scalar_lea.vmem %s1165_s7, 384  ;;  %s1030_s20 = smov [#allocation6]  }
  0x40   : > { %p943_p4 = scmp.ne.s32.totalorder %s1165_s7, %s942_s4  ;;  %s947_s21 = sshll.u32 %s1030_s20, 4  ;;  %s948_s21 = int_to_ptr.vmem [resolvable:$false] %s947_s21 }
  0x41   : > { %s949_s23 = scalar_lea.vmem %s948_s21, 768  ;;  %p950_p6 = scmp.lt.s32.totalorder %s1165_s7, %s948_s21 }
  0x42   : > { %p945_p5 = pnand %p943_p4, %p929_p12  ;;  %p951_p13 = scmp.lt.s32.totalorder %s949_s23, %s942_s4 }
  0x44   : > { %p946_p0 = pneg %p945_p5  ;;  %p952_p7 = por %p951_p13, %p950_p6 }
  0x46   : > { %p953_p3 = pnand %p952_p7, %p946_p0 }
  0x48   : > { %956 = shalt.err (!%p953_p3)
}
  0x49   : > { %s1031_s28 = smov 256   ;;  %s1032_s8 = smov 128  }
  0x4a   : > { %s1033_s9 = smov 8   ;;  %p1384_p12 = scmp.ne.s32.totalorder %s1379_s27, 0 }
  0x4b   : > { %813 = dma.hbm_to_vmem [thread:$0]  (!%p1383_p11), %s1163_s10, 384, %s1165_s7, %s1167_s30, %s1031_s28, %s1032_s8, %s1033_s9  }
  0x4c   : > { %169 = sbr.rel (%p1384_p12) target bundleno = 406 (0x196), region = 32  ;;  %p1385_p1 = scmp.eq.s32.totalorder (!%p1384_p12), %s1083_s0, 0 }
  0x53   : > { %1002 = dma.done.wait (%p1385_p1), [#allocation4], 128   ;;  %p1386_p8 = pmov %p1385_p1 }
  0x54   : > { %s1202_s11 = sand.u32 1, %s1019_s15   ;;  %p1387_p9 = scmp.ne.s32.totalorder %s1376_s24, 0 }
  0x55   : > { %1004 = vsyncadd (%p1386_p8), [#allocation4], 4294967168  ;;  %s797_s29 = smul.u32 24, %s1202_s11  ;;  %s176_s6 = scalar_lea.sflag [#allocation7], %s1202_s11 }
  0x57   : > { %s179_s12 = scalar_lea.vmem [#allocation6], %s797_s29 }
  0x58   : > { %1006 = dma.done.wait (%p1387_p9), %s176_s6, 384  }
  0x59   : > { %1008 = vsyncadd (%p1387_p9), %s176_s6, 4294966912  ;;  %v208_v0 = vlaneseq  ;;  %s201_s27 = sld [smem:[#allocation2]]  ;;  %v1034_v1 = vmov 0.0|0.0   ;;  %v1035_v2 = vmov 1966171168   ;;  %vm1036_vm0 = vmmov 0  }
  0x5a   : > { %784 = vmatprep.subr.bf16.mxu0 %v1034_v1  ;;  %v206_v3 = vunpack.c.l.s4 %v1035_v2  ;;  %v1037_v5 = vmov 0.0   ;;  %v1213_v8 = vld [vmem:[%s179_s12] sm:$0xff]  ;;  %v1217_v10 = vld [vmem:[%s179_s12 + $0x8] sm:$0xff]  ;;  %v1219_v11 = vld [vmem:[%s179_s12 + $0x10] sm:$0xff]  ;;  %vm575_vm1 = vcmask 523264   ;;  %s753_s24 = sshll.u32 %s1083_s0, 4 }
  0x5b   : > { %v209_v4 = vshrl.u32 %v208_v0, 7  ;;  %781 = vmatprep.mubr.msk.f32.mxu0 %vm1036_vm0, %v1037_v5  ;;  %v204_v15 = vcombine.high %v1213_v8, %v1213_v8  ;;  %v312_v17 = vcombine.high %v1217_v10, %v1217_v10  ;;  %v428_v18 = vcombine.high %v1219_v11, %v1219_v11  ;;  %s200_s5 = scalar_lea.vmem [#allocation8], %s1202_s11  ;;  %s1322_s13 = scalar_lea.hbm %s1369_s3, %s753_s24 }
  0x5c   : > { %v207_v6 = vunpack.c.0.s8 %v206_v3  ;;  %s665_s7 = sshll.u32 %s200_s5, 4  ;;  %s653_s18 = scalar_lea.sflag [#allocation5], %s1202_s11  ;;  %s1324_s7 = int_to_ptr.vmem [resolvable:$true] %s665_s7 }
  0x5d   : > { %v1215_v9 = vsub.s32 0, %v209_v4  ;;  %s957_s4 = scalar_lea.vmem %s1324_s7, 16  ;;  %p1388_p10 = scmp.ne.s32.totalorder %s1377_s25, 0 }
  0x5e   : > { %v1211_v7 = vsub.s32 %v207_v6, %v209_v4  ;;  %p958_p11 = scmp.ne.s32.totalorder %s1324_s7, %s957_s4  ;;  %s1038_s0 = smov [#allocation8]  }
  0x5f   : > { %v1229_v16 = vstv %s201_s27  ;;  %s961_s20 = sshll.u32 %s1038_s0, 4  ;;  %s962_s20 = int_to_ptr.vmem [resolvable:$false] %s961_s20 }
  0x60   : > { %v211_v12 = vrot.slane %v1213_v8, %v1211_v7  ;;  %v319_v13 = vrot.slane %v1217_v10, %v1211_v7  ;;  %v435_v14 = vrot.slane %v1219_v11, %v1211_v7  ;;  %v218_v25 = vrot.slane %v204_v15, %v1211_v7  ;;  %p959_p2 = pnand %p958_p11, %p1388_p10  ;;  %s963_s21 = scalar_lea.vmem %s962_s20, 32 }
  0x61   : > { %v1240_v26 = vrot.slane %v312_v17, %v1211_v7  ;;  %p964_p5 = scmp.lt.s32.totalorder %s1324_s7, %s962_s20  ;;  %p965_p0 = scmp.lt.s32.totalorder %s963_s21, %s957_s4 }
  0x62   : > { %v219_v19 = vcombine.high %v211_v12, %v211_v12  ;;  %v227_v20 = vrot.slane %v211_v12, %v1211_v7  ;;  %v327_v21 = vcombine.high %v319_v13, %v319_v13  ;;  %v335_v22 = vrot.slane %v319_v13, %v1211_v7  ;;  %p960_p4 = pneg %p959_p2 }
  0x63   : > { %v443_v23 = vcombine.high %v435_v14, %v435_v14  ;;  %v451_v24 = vrot.slane %v435_v14, %v1211_v7  ;;  %v220_v12 = vcombine.high %v218_v25, %v218_v25  ;;  %v234_v17 = vrot.slane %v218_v25, %v1211_v7  ;;  %p966_p6 = por %p965_p0, %p964_p5 }
  0x64   : > { %v241_v27 = vrot.slane %v219_v19, %v1211_v7  ;;  %v249_v28 = vcombine.high %v227_v20, %v227_v20  ;;  %v256_v29 = vrot.slane %v227_v20, %v1215_v9  ;;  %v349_v30 = vrot.slane %v327_v21, %v1211_v7 }
  0x65   : > { %v357_v31 = vcombine.high %v335_v22, %v335_v22  ;;  %v364_v32 = vrot.slane %v335_v22, %v1215_v9  ;;  %v465_v33 = vrot.slane %v443_v23, %v1211_v7  ;;  %v473_v34 = vcombine.high %v451_v24, %v451_v24  ;;  %p967_p13 = pnand %p966_p6, %p960_p4 }
  0x66   : > { %v251_v35 = vcombine.high %v241_v27, %v241_v27  ;;  %v260_v36 = vrot.slane %v241_v27, %v1215_v9  ;;  %v293_v37 = vsub.f32 %v256_v29, %v1213_v8  ;;  %v359_v38 = vcombine.high %v349_v30, %v349_v30 }
  0x67   : > { %v368_v39 = vrot.slane %v349_v30, %v1215_v9  ;;  %v401_v40 = vsub.f32 %v364_v32, %v1217_v10  ;;  %v475_v41 = vcombine.high %v465_v33, %v465_v33  ;;  %v480_v42 = vrot.slane %v451_v24, %v1215_v9 }
  0x68   : > { %v294_v43 = vsub.f32 %v260_v36, %v1213_v8  ;;  %v301_v44 = vmul.f32 %v293_v37, %v293_v37  ;;  %v484_v45 = vrot.slane %v465_v33, %v1215_v9  ;;  %v264_v46 = vrot.slane %v249_v28, %v1215_v9 }
  0x69   : > { %v402_v47 = vsub.f32 %v368_v39, %v1217_v10  ;;  %v409_v48 = vmul.f32 %v401_v40, %v401_v40  ;;  %v517_v49 = vsub.f32 %v480_v42, %v1219_v11  ;;  %v268_v50 = vrot.slane %v251_v35, %v1215_v9 }
  0x6a   : > { %v302_v51 = vmul.f32 %v294_v43, %v294_v43  ;;  %v518_v52 = vsub.f32 %v484_v45, %v1219_v11  ;;  %v295_v53 = vsub.f32 %v264_v46, %v1213_v8  ;;  %v372_v54 = vrot.slane %v357_v31, %v1215_v9 }
  0x6b   : > { %v410_v55 = vmul.f32 %v402_v47, %v402_v47  ;;  %v417_v56 = vadd.f32 %v409_v48, %v301_v44  ;;  %v525_v57 = vmul.f32 %v517_v49, %v517_v49  ;;  %v296_v58 = vsub.f32 %v268_v50, %v1213_v8 }
  0x6c   : > { %v526_v59 = vmul.f32 %v518_v52, %v518_v52  ;;  %v303_v60 = vmul.f32 %v295_v53, %v295_v53  ;;  %v376_v61 = vrot.slane %v359_v38, %v1215_v9  ;;  %v403_v62 = vsub.f32 %v372_v54, %v1217_v10 }
  0x6d   : > { %v418_v63 = vadd.f32 %v410_v55, %v302_v51  ;;  %v533_v0 = vadd.f32 %v525_v57, %v417_v56  ;;  %v304_v2 = vmul.f32 %v296_v58, %v296_v58  ;;  %v488_v3 = vrot.slane %v473_v34, %v1215_v9 }
  0x6e   : > { %v404_v4 = vsub.f32 %v376_v61, %v1217_v10  ;;  %v411_v5 = vmul.f32 %v403_v62, %v403_v62  ;;  %v492_v6 = vrot.slane %v475_v41, %v1215_v9  ;;  %v248_v22 = vrot.slane %v220_v12, %v1211_v7 }
  0x6f   : > { %v534_v13 = vadd.f32 %v526_v59, %v418_v63  ;;  %v541_v14 = vadd.f32 1e-30, %v533_v0  ;;  %v519_v15 = vsub.f32 %v488_v3, %v1219_v11  ;;  %v272_v27 = vrot.slane %v234_v17, %v1215_v9 }
  0x70   : > { %v412_v19 = vmul.f32 %v404_v4, %v404_v4  ;;  %v419_v20 = vadd.f32 %v411_v5, %v303_v60  ;;  %v520_v21 = vsub.f32 %v492_v6, %v1219_v11  ;;  %v276_v30 = vrot.slane %v248_v22, %v1215_v9 }
  0x71   : > { %v542_v23 = vadd.f32 1e-30, %v534_v13  ;;  %865 = vrsqrt.f32 %v541_v14  ;;  %v527_v24 = vmul.f32 %v519_v15, %v519_v15  ;;  %v328_v31 = vcombine.high %v1240_v26, %v1240_v26 }
  0x72   : > { %v420_v28 = vadd.f32 %v412_v19, %v304_v2  ;;  %v528_v29 = vmul.f32 %v520_v21, %v520_v21  ;;  %v297_v32 = vsub.f32 %v272_v27, %v1213_v8  ;;  %v342_v33 = vrot.slane %v1240_v26, %v1211_v7 }
  0x73   : > { %867 = vrsqrt.f32 %v542_v23  ;;  %v535_v25 = vadd.f32 %v527_v24, %v419_v20  ;;  %v298_v35 = vsub.f32 %v276_v30, %v1213_v8  ;;  %v356_v36 = vrot.slane %v328_v31, %v1211_v7 }
  0x74   : > { %v536_v34 = vadd.f32 %v528_v29, %v420_v28  ;;  %v442_v37 = vrot.slane %v428_v18, %v1211_v7  ;;  %v305_v39 = vmul.f32 %v297_v32, %v297_v32  ;;  %v380_v40 = vrot.slane %v342_v33, %v1215_v9 }
  0x75   : > { %v543_v38 = vadd.f32 1e-30, %v535_v25  ;;  %v250_v41 = vcombine.high %v234_v17, %v234_v17  ;;  %v306_v43 = vmul.f32 %v298_v35, %v298_v35  ;;  %v384_v44 = vrot.slane %v356_v36, %v1215_v9 }
  0x76   : > { %v544_v42 = vadd.f32 1e-30, %v536_v34  ;;  %v444_v26 = vcombine.high %v442_v37, %v442_v37  ;;  %v405_v45 = vsub.f32 %v380_v40, %v1217_v10  ;;  %v458_v46 = vrot.slane %v442_v37, %v1211_v7 }
  0x77   : > { %869 = vrsqrt.f32 %v543_v38  ;;  %v252_v47 = vcombine.high %v248_v22, %v248_v22  ;;  %v406_v48 = vsub.f32 %v384_v44, %v1217_v10  ;;  %v280_v49 = vrot.slane %v250_v41, %v1215_v9 }
  0x78   : > { %871 = vrsqrt.f32 %v544_v42  ;;  %v472_v18 = vrot.slane %v444_v26, %v1211_v7  ;;  %v413_v50 = vmul.f32 %v405_v45, %v405_v45  ;;  %v496_v51 = vrot.slane %v458_v46, %v1215_v9 }
  0x79   : > { %v284_v52 = vrot.slane %v252_v47, %v1215_v9  ;;  %v358_v53 = vcombine.high %v342_v33, %v342_v33  ;;  %v414_v54 = vmul.f32 %v406_v48, %v406_v48  ;;  %v299_v56 = vsub.f32 %v280_v49, %v1213_v8 }
  0x7a   : > { %v500_v55 = vrot.slane %v472_v18, %v1215_v9  ;;  %v360_v57 = vcombine.high %v356_v36, %v356_v36  ;;  %v421_v59 = vadd.f32 %v413_v50, %v305_v39  ;;  %v521_v60 = vsub.f32 %v496_v51, %v1219_v11 }
  0x7b   : > { %v866_v58 = vpop.eup %865  ;;  %v300_v7 = vsub.f32 %v284_v52, %v1213_v8  ;;  %v388_v61 = vrot.slane %v358_v53, %v1215_v9  ;;  %v422_v63 = vadd.f32 %v414_v54, %v306_v43  ;;  %v307_v2 = vmul.f32 %v299_v56, %v299_v56 }
  0x7c   : > { %v558_v62 = vadd.f32 %v866_v58, %v1229_v16  ;;  %v522_v0 = vsub.f32 %v500_v55, %v1219_v11  ;;  %v529_v4 = vmul.f32 %v521_v60, %v521_v60  ;;  %v392_v6 = vrot.slane %v360_v57, %v1215_v9  ;;  %v574_v57 = vld [vmem:[#allocation3] sm:$0xff] }
  0x7d   : > { %v868_v3 = vpop.eup %867  ;;  %v308_v5 = vmul.f32 %v300_v7, %v300_v7  ;;  %v407_v12 = vsub.f32 %v388_v61, %v1217_v10  ;;  %v474_v8 = vcombine.high %v458_v46, %v458_v46  ;;  %v476_v20 = vcombine.high %v472_v18, %v472_v18 }
  0x7e   : > { %v559_v13 = vadd.f32 %v868_v3, %v1229_v16  ;;  %873 = vrcp.f32 %v558_v62  ;;  %v530_v14 = vmul.f32 %v522_v0, %v522_v0  ;;  %v537_v15 = vadd.f32 %v529_v4, %v421_v59 }
  0x7f   : > { %v408_v17 = vsub.f32 %v392_v6, %v1217_v10  ;;  %v415_v19 = vmul.f32 %v407_v12, %v407_v12  ;;  %v504_v22 = vrot.slane %v474_v8, %v1215_v9  ;;  %v508_v28 = vrot.slane %v476_v20, %v1215_v9 }
  0x80   : > { %875 = vrcp.f32 %v559_v13  ;;  %v538_v21 = vadd.f32 %v530_v14, %v422_v63  ;;  %v545_v24 = vadd.f32 1e-30, %v537_v15 }
  0x81   : > { %v870_v23 = vpop.eup %869  ;;  %v416_v27 = vmul.f32 %v408_v17, %v408_v17  ;;  %v423_v25 = vadd.f32 %v415_v19, %v307_v2  ;;  %v523_v32 = vsub.f32 %v504_v22, %v1219_v11  ;;  %v524_v34 = vsub.f32 %v508_v28, %v1219_v11 }
  0x82   : > { %v872_v29 = vpop.eup %871  ;;  %v560_v30 = vadd.f32 %v870_v23, %v1229_v16  ;;  %v546_v31 = vadd.f32 1e-30, %v538_v21  ;;  %877 = vrsqrt.f32 %v545_v24 }
  0x83   : > { %v561_v10 = vadd.f32 %v872_v29, %v1229_v16  ;;  %v424_v33 = vadd.f32 %v416_v27, %v308_v5  ;;  %v531_v35 = vmul.f32 %v523_v32, %v523_v32  ;;  %v532_v36 = vmul.f32 %v524_v34, %v524_v34 }
  0x84   : > { %879 = vrcp.f32 %v560_v30 }
  0x85   : > { %881 = vrcp.f32 %v561_v10  ;;  %v539_v37 = vadd.f32 %v531_v35, %v423_v25  ;;  %v540_v9 = vadd.f32 %v532_v36, %v424_v33 }
  0x86   : > { %883 = vrsqrt.f32 %v546_v31 }
  0x87   : > { %v547_v39 = vadd.f32 1e-30, %v539_v37  ;;  %v548_v40 = vadd.f32 1e-30, %v540_v9 }
  0x88   : > { %v874_v38 = vpop.eup %873 }
  0x89   : > { %885 = vrsqrt.f32 %v547_v39 }
  0x8a   : > { %v876_v41 = vpop.eup %875  ;;  %887 = vrsqrt.f32 %v548_v40 }
  0x8b   : > { %v785_v42 = vpack.c.bf16 %v876_v41, %v874_v38 }
  0x8c   : > { %v878_v43 = vpop.eup %877 }
  0x8d   : > { %786 = vmatpush3.bf16.msra.mxu0 %v785_v42  ;;  %v562_v11 = vadd.f32 %v878_v43, %v1229_v16 }
  0x8e   : > { %v880_v44 = vpop.eup %879  ;;  %787 = vmatprep.subr.bf16.mxu0 %v1034_v1 }
  0x8f   : > { %v882_v26 = vpop.eup %881  ;;  %889 = vrcp.f32 %v562_v11 }
  0x90   : > { %v884_v45 = vpop.eup %883  ;;  %v788_v46 = vpack.c.bf16 %v882_v26, %v880_v44 }
  0x91   : > { %v563_v47 = vadd.f32 %v884_v45, %v1229_v16 }
  0x92   : > { %789 = vmatpush3.bf16.msra.mxu0 %v788_v46 }
  0x93   : > { %790 = vmatprep.subr.bf16.mxu0 %v1034_v1  ;;  %891 = vrcp.f32 %v563_v47  ;;  %v886_v48 = vpop.eup %885 }
  0x94   : > { %v888_v18 = vpop.eup %887  ;;  %v564_v49 = vadd.f32 %v886_v48, %v1229_v16 }
  0x95   : > { %v565_v50 = vadd.f32 %v888_v18, %v1229_v16 }
  0x96   : > { %893 = vrcp.f32 %v564_v49 }
  0x97   : > { %895 = vrcp.f32 %v565_v50 }
  0x99   : > { %v890_v51 = vpop.eup %889 }
  0x9d   : > { %v892_v52 = vpop.eup %891 }
  0x9e   : > { %v791_v53 = vpack.c.bf16 %v892_v52, %v890_v51 }
  0xa0   : > { %792 = vmatpush3.bf16.msra.mxu0 %v791_v53  ;;  %v894_v54 = vpop.eup %893 }
  0xa1   : > { %793 = vmatprep.subr.bf16.mxu0 %v1034_v1  ;;  %v896_v55 = vpop.eup %895 }
  0xa2   : > { %v794_v56 = vpack.c.bf16 %v896_v55, %v894_v54 }
  0xa4   : > { %795 = vmatpush3.bf16.msra.mxu0 %v794_v56 }
  0xa7   : > { %782 = vmatmul.mubr.msk.f32.vlgmr.msra.gmra.mrb[0].mxu0 %vm575_vm1, %v574_v57 }
 0x17a   : > { %v645_v16 = vpop.f32.mrb[0].mxu0 }
 0x17b   : > { %v649_v58 = vmul.f32 1.442695, %v645_v16  ;;  %v783_v59 = vpop.f32.mrb[1].mxu0 }
 0x17d   : > { %897 = vpow2.f32 %v649_v58 }
 0x187   : > { %v898_v1 = vpop.eup %897 }
 0x188   : > { %651 = vst [vmem:[%s200_s5] sm:$0x1] %v898_v1 }
 0x189   : > { %970 = shalt.err (!%p967_p13)
}
 0x18a   : > { %s971_s23 = scalar_lea.hbm %s1322_s13, 16  ;;  %s975_s9 = scalar_lea.hbm %s1369_s3, 32 }
 0x18b   : > { %p972_p7 = scmp.ne.s32.totalorder %s1322_s13, %s971_s23  ;;  %p976_p1 = scmp.lt.u32.totalorder %s1322_s13, %s1369_s3 }
 0x18c   : > { %p977_p8 = scmp.lt.u32.totalorder %s975_s9, %s971_s23  ;;  %p979_p11 = scmp.lt.u32.totalorder %s971_s23, %s1322_s13 }
 0x18d   : > { %p973_p3 = pnand %p972_p7, %p1388_p10 }
 0x18e   : > { %p978_p9 = por %p977_p8, %p976_p1 }
 0x18f   : > { %p974_p12 = pneg %p973_p3 }
 0x190   : > { %p980_p2 = por %p979_p11, %p978_p9 }
 0x192   : > { %p981_p4 = pnand %p980_p2, %p974_p12 }
 0x194   : > { %984 = shalt.err (!%p981_p4)
}
 0x195   : > { %804 = dma.vmem_to_hbm [thread:$0]  (%p1388_p10), %s1324_s7, 16, %s1322_s13, %s653_s18  }
 0x196 PF: > { %s677_s6 = sand.u32 1, %s1015_s14   ;;  %p1389_p5 = scmp.ne.s32.totalorder %s1378_s26, 0 }
 0x197   : > { %p1390_p0 = scmp.ge.s32.totalorder %s1027_s17, 2  ;;  %s678_s12 = scalar_lea.sflag [#allocation5], %s677_s6 }
 0x199   : > { %p815_p6 = pnand %p1390_p0, %p1389_p5 }
 0x19b   : > { %1010 = dma.done.wait (!%p815_p6), %s678_s12, 16  }
 0x19c   : > { %1012 = vsyncadd (!%p815_p6), %s678_s12, 4294967280  ;;  %p18_p13 = scmp.ge.s32.totalorder %s1087_s19, 4   ;;  %s1391_s14 = smov %s1019_s15 }
 0x19d   : > { %s1392_s15 = smov %s1023_s16  ;;  %s1393_s16 = smov %s1099_s22 }
 0x19e   : > { %s1394_s17 = smov %s1087_s19  ;;  %20 = sbr.rel (!%p18_p13) target bundleno = 8 (0x8), region = 84 }
 0x1a5   :  { %682 = vsyncpa [#allocation4], 1 }
 0x1a6   :  { %684 = vsyncpa [#allocation4 + $0x1], 1 }
 0x1a7   :  { %685 = vsyncpa [#allocation7], 1 }
 0x1a8   :  { %687 = vsyncpa [#allocation7 + $0x1], 1 }
 0x1a9   :  { %688 = vsyncpa [#allocation5], 1 }
 0x1aa   :  { %690 = vsyncpa [#allocation5 + $0x1], 1 }

</bundles_post_ra>
